<compile_context>
chip_gen: v7x
topology: tpu7x:2x2x1
jax: 0.10.0
libtpu: 0.0.40
codegen_flags: <defaults>
</compile_context>

<pallas_src>
import functools

import jax
import jax.numpy as jnp
from jax.experimental import pallas as pl
from jax.experimental.pallas import tpu as pltpu


_SUBLANES = 8
_LANES = 128
_NSTATS = 11  # packed stat lanes used by the discriminator kernel


# ----------------------------- VMEM budgeting -------------------------------

def _vmem_capacity_bytes():
    try:
        info = pltpu.get_tpu_info()
        cap = int(getattr(info, "vmem_capacity_bytes", 0))
        if cap > 0:
            return cap
    except Exception:
        pass
    return 64 * 1024 * 1024  # conservative v7x floor


def _round_up(x, m):
    return (x + m - 1) // m * m


def _pick_batch_tile(batch, d, hp, *, streams, act_bytes, w_bytes, max_tile):
    """Batch tile + grid size + vmem limit, generation-aware."""
    vmem_phys = _vmem_capacity_bytes()
    vmem_limit = int(min(vmem_phys, 128 * 1024 * 1024) * 0.75)
    # Constant-index weights are still double-buffered by the pipeline.
    resident = 2 * (d * hp * w_bytes + 2 * hp * 4 + 4)
    budget = max(0, vmem_limit - resident - (2 << 20))
    # 2x double-buffered activation tile + in-body f32 hidden activation/temps.
    per_row = streams * (2 * d * act_bytes + hp * 4 + 64)
    cap = max(8, budget // per_row)
    cap = int(min(cap, max_tile, batch))

    tb = None
    for t in range(8, cap + 1, 8):          # largest multiple-of-8 divisor <= cap
        if batch % t == 0:
            tb = t
    if tb is None:
        # TODO(synk): pad+mask odd batches; single full block for now.
        tb = batch
    if tb == batch and batch >= 256 and batch % 16 == 0:
        tb = batch // 2  # keep >=2 grid steps so v7x can use both TensorCores
    return tb, batch // tb, vmem_limit


# ----------------------------- kernel bodies --------------------------------

def _log_sigmoid(z):
    # Single stable formula: log(sigmoid(z)) = min(z, 0) - log1p(exp(-|z|)).
    return jnp.minimum(z, 0.0) - jnp.log1p(jnp.exp(-jnp.abs(z)))


def _critic_logit_row(x_ref, w1_ref, b1_ref, w2row_ref, b2_ref):
    """critic(x) for a (TB, D) tile -> lane-dense (1, TB) f32 logits."""
    h = jnp.tanh(jnp.dot(x_ref[...], w1_ref[...],
                         preferred_element_type=jnp.float32) + b1_ref[...])
    # Second layer (H -> 1) as a transposed-RHS MXU matmul so the logits come
    # out lane-major (1, TB) instead of a lane-sparse (TB, 1) column.
    z = jnp.einsum("ah,bh->ab", w2row_ref[...], h,
                   preferred_element_type=jnp.float32) + b2_ref[...]
    return z


def _stream_stats(z, flipped):
    """Per-tile partial stats for one stream; each returned as (1, 1) f32."""
    zf = z if flipped > 0 else -z                  # flipped * z (static sign)
    ls_pos = _log_sigmoid(zf)                      # logsig( flipped * z)
    ls_neg = ls_pos - zf                           # logsig(-flipped * z)
    lsz = ls_pos if flipped > 0 else ls_neg        # logsig(z)
    sig = jnp.exp(lsz)                             # sigmoid(z)
    c = sig - 0.5                                  # centered -> stable variance
    s = lambda v: jnp.sum(v, keepdims=True)
    return (s(ls_pos), s(ls_neg), s(c), s(c * c),
            jnp.min(sig, keepdims=True), jnp.max(sig, keepdims=True))


def _pack_lanes(values):
    """Pack scalar partials into one lane-dense (8, 128) f32 row (lane k = values[k])."""
    lane = jax.lax.broadcasted_iota(jnp.int32, (_SUBLANES, _LANES), 1)
    row = jnp.zeros((_SUBLANES, _LANES), jnp.float32)
    for k, v in enumerate(values):
        row = jnp.where(lane == k, v, row)
    return row


# Packed stat lanes (per grid step, per output block):
#  0: sum logsig( flipped*z_real)   1: sum logsig(-flipped*z_fake)
#  2: sum (sig_real-0.5)            3: sum (sig_fake-0.5)
#  4: sum (sig_real-0.5)^2          5: sum (sig_fake-0.5)^2
#  6: min sig_real                  7: min sig_fake
#  8: max sig_real                  9: max sig_fake
# 10: sum logsig( flipped*z_fake)   (fused generator loss)
def _gan_disc_kernel(xr_ref, xf_ref, w1_ref, b1_ref, w2row_ref, b2_ref,
                     out_ref, *, flipped):
    z_r = _critic_logit_row(xr_ref, w1_ref, b1_ref, w2row_ref, b2_ref)
    z_f = _critic_logit_row(xf_ref, w1_ref, b1_ref, w2row_ref, b2_ref)
    lsp_r, _lsn_r, sc_r, sc2_r, mn_r, mx_r = _stream_stats(z_r, flipped)
    lsp_f, lsn_f, sc_f, sc2_f, mn_f, mx_f = _stream_stats(z_f, flipped)
    out_ref[...] = _pack_lanes((lsp_r, lsn_f, sc_r, sc_f, sc2_r, sc2_f,
                                mn_r, mn_f, mx_r, mx_f, lsp_f))


def _gan_gen_kernel(xf_ref, w1_ref, b1_ref, w2row_ref, b2_ref, out_ref,
                    *, flipped):
    z_f = _critic_logit_row(xf_ref, w1_ref, b1_ref, w2row_ref, b2_ref)
    zf = z_f if flipped > 0 else -z_f
    lsp = _log_sigmoid(zf)
    out_ref[...] = _pack_lanes((jnp.sum(lsp, keepdims=True),))


# ----------------------------- pallas_call builders -------------------------

def _common_specs(tb, d, hp):
    x_spec = pl.BlockSpec((tb, d), lambda i: (i, 0))
    w1_spec = pl.BlockSpec((d, hp), lambda i: (0, 0))    # VMEM-resident weights
    b1_spec = pl.BlockSpec((1, hp), lambda i: (0, 0))
    w2_spec = pl.BlockSpec((1, hp), lambda i: (0, 0))
    b2_spec = pl.BlockSpec((1, 1), lambda i: (0, 0))
    out_spec = pl.BlockSpec((_SUBLANES, _LANES), lambda i: (i, 0))
    return x_spec, w1_spec, b1_spec, w2_spec, b2_spec, out_spec


@functools.lru_cache(maxsize=None)
def _build_disc_call(batch, d, hp, flipped, act_name, w_name, max_tile):
    act_dt, w_dt = jnp.dtype(act_name), jnp.dtype(w_name)
    tb, nt, vmem_limit = _pick_batch_tile(
        batch, d, hp, streams=2, act_bytes=act_dt.itemsize,
        w_bytes=w_dt.itemsize, max_tile=max_tile)
    x_spec, w1_spec, b1_spec, w2_spec, b2_spec, out_spec = _common_specs(tb, d, hp)
    kernel = functools.partial(_gan_disc_kernel, flipped=flipped)
    call = pl.pallas_call(
        kernel,
        out_shape=jax.ShapeDtypeStruct((nt * _SUBLANES, _LANES), jnp.float32),
        grid=(nt,),
        in_specs=[x_spec, x_spec, w1_spec, b1_spec, w2_spec, b2_spec],
        out_specs=out_spec,
        compiler_params=pltpu.CompilerParams(
            dimension_semantics=("parallel",),      # v7x: split tiles across TCs
            vmem_limit_bytes=vmem_limit),
    )
    return call, nt


@functools.lru_cache(maxsize=None)
def _build_gen_call(batch, d, hp, flipped, act_name, w_name, max_tile):
    act_dt, w_dt = jnp.dtype(act_name), jnp.dtype(w_name)
    tb, nt, vmem_limit = _pick_batch_tile(
        batch, d, hp, streams=1, act_bytes=act_dt.itemsize,
        w_bytes=w_dt.itemsize, max_tile=max_tile)
    x_spec, w1_spec, b1_spec, w2_spec, b2_spec, out_spec = _common_specs(tb, d, hp)
    kernel = functools.partial(_gan_gen_kernel, flipped=flipped)
    call = pl.pallas_call(
        kernel,
        out_shape=jax.ShapeDtypeStruct((nt * _SUBLANES, _LANES), jnp.float32),
        grid=(nt,),
        in_specs=[x_spec, w1_spec, b1_spec, w2_spec, b2_spec],
        out_specs=out_spec,
        compiler_params=pltpu.CompilerParams(
            dimension_semantics=("parallel",),
            vmem_limit_bytes=vmem_limit),
    )
    return call, nt


# ----------------------------- module wrapper --------------------------------

class GANLoss:
    """JAX/Pallas port of the PyTorch GANLoss module (2-layer MLP critic)."""

    def __init__(self, feature_dim: int, hidden_dim: int, k: int = 1,
                 flipped: bool = False, key=None,
                 compute_dtype=jnp.bfloat16, max_batch_tile: int = 4096):
        self.k = k
        self._critic_opt_step_counter = 0
        # NOTE: `flipped` is a constructor-time constant baked into the kernel.
        self.flipped = -1.0 if flipped else 1.0
        self.max_batch_tile = int(max_batch_tile)
        # bf16 default: MXU inputs + streamed activations; stats math stays f32.
        self.compute_dtype = jnp.dtype(compute_dtype)
        self.hidden_dim = hidden_dim
        self.hidden_pad = _round_up(hidden_dim, 128)

        if key is None:
            key = jax.random.PRNGKey(42)
        k1, k2, k3 = jax.random.split(key, 3)
        self.w1 = (jax.random.normal(k1, (feature_dim, hidden_dim), jnp.float32)
                   / jnp.sqrt(feature_dim))
        self.b1 = jnp.zeros((1, hidden_dim), jnp.float32)
        self.w2 = (jax.random.normal(k2, (hidden_dim, 1), jnp.float32)
                   / jnp.sqrt(hidden_dim))
        self.b2 = 0.01 * jax.random.normal(k3, (1, 1), jnp.float32)

        # Kernel-layout copies: hidden dim zero-padded to a lane multiple; W1 in
        # the (bf16) compute dtype, biases / w2 row in f32 (second layer is f32).
        hp = self.hidden_pad
        self.w1_k = (jnp.zeros((feature_dim, hp), jnp.float32)
                     .at[:, :hidden_dim].set(self.w1)).astype(self.compute_dtype)
        self.b1_k = jnp.zeros((1, hp), jnp.float32).at[:, :hidden_dim].set(self.b1)
        self.w2row_k = (jnp.zeros((1, hp), jnp.float32)
                        .at[:, :hidden_dim].set(self.w2.reshape(1, hidden_dim)))
        self.b2_k = self.b2

    # step-counter bookkeeping (no tensor compute)
    def increment_step_counter(self):
        self._critic_opt_step_counter += 1

    def zero_step_counter(self):
        self._critic_opt_step_counter = 0

    def run_generator_opt_step(self):
        return self._critic_opt_step_counter >= self.k

    def forward(self, x_fake, x_real=None, wandb_prefix="train", *,
                include_generator_loss=False):
        del wandb_prefix  # TODO(synk): wandb histogram / vmapped grad logging omitted.
        b, d = x_fake.shape
        hp = self.hidden_pad
        act = self.compute_dtype
        params = (self.w1_k, self.b1_k, self.w2row_k, self.b2_k)

        if x_real is not None:
            call, nt = _build_disc_call(b, d, hp, self.flipped, act.name,
                                        self.compute_dtype.name, self.max_batch_tile)
            raw = call(x_real.astype(act), x_fake.astype(act), *params)
            parts = raw.reshape(nt, _SUBLANES, _LANES)[:, 0, :]   # (nt, 128)
            sums = parts.sum(axis=0)
            mins = parts.min(axis=0)
            maxs = parts.max(axis=0)
            inv_n = 1.0 / b
            mean_r = 0.5 + sums[2] * inv_n
            mean_f = 0.5 + sums[3] * inv_n
            if b > 1:  # static Python branch
                inv_nm1 = 1.0 / (b - 1)
                var_r = jnp.maximum(sums[4] - sums[2] * sums[2] * inv_n, 0.0) * inv_nm1
                var_f = jnp.maximum(sums[5] - sums[3] * sums[3] * inv_n, 0.0) * inv_nm1
                std_r, std_f = jnp.sqrt(var_r), jnp.sqrt(var_f)
            else:
                std_r = jnp.float32(jnp.nan)   # torch .std() of a single sample
                std_f = jnp.float32(jnp.nan)
            out = {
                "loss": (sums[0] + sums[1]) * inv_n,
                "d-real-mean": mean_r,
                "d-fake-mean": mean_f,
                "d-real-std": std_r,
                "d-fake-std": std_f,
                "d-real-min": mins[6],
                "d-fake-min": mins[7],
                "d-real-max": maxs[8],
                "d-fake-max": maxs[9],
            }
            if include_generator_loss:
                out["loss-generator"] = -sums[10] * inv_n
            return out

        call, nt = _build_gen_call(b, d, hp, self.flipped, act.name,
                                   self.compute_dtype.name, self.max_batch_tile)
        raw = call(x_fake.astype(act), *params)
        parts = raw.reshape(nt, _SUBLANES, _LANES)[:, 0, :]
        return {"loss": -parts[:, 0].sum() / b}

    __call__ = forward


# ----------------------------- reference (pure JAX) --------------------------

def _ref_logits(gan, x):
    xw = x.astype(gan.compute_dtype)
    w1 = gan.w1.astype(gan.compute_dtype)
    h = jnp.tanh(jnp.dot(xw, w1, preferred_element_type=jnp.float32) + gan.b1)
    return (h @ gan.w2 + gan.b2)[:, 0]


def _reference(gan, x_fake, x_real):
    lr_real = _ref_logits(gan, x_real)
    lr_fake = _ref_logits(gan, x_fake)
    l1 = jnp.mean(jax.nn.log_sigmoid(gan.flipped * lr_real))
    l0 = jnp.mean(jax.nn.log_sigmoid(-gan.flipped * lr_fake))
    sr = jax.nn.sigmoid(lr_real)
    sf = jax.nn.sigmoid(lr_fake)
    return {
        "loss": l1 + l0,
        "d-real-mean": sr.mean(), "d-fake-mean": sf.mean(),
        "d-real-std": jnp.std(sr, ddof=1), "d-fake-std": jnp.std(sf, ddof=1),
        "d-real-min": sr.min(), "d-fake-min": sf.min(),
        "d-real-max": sr.max(), "d-fake-max": sf.max(),
    }


if __name__ == "__main__":
    # ---- small demo shapes (grid of 1) ----
    B, D, H = 8, 32, 32
    key = jax.random.PRNGKey(0)
    k_fake, k_real = jax.random.split(key)
    x_fake = jax.random.normal(k_fake, (B, D), jnp.float32)
    x_real = jax.random.normal(k_real, (B, D), jnp.float32) + 0.5

    gan = GANLoss(feature_dim=D, hidden_dim=H, k=1, flipped=False)

    out_d = gan(x_fake, x_real, include_generator_loss=True)
    jax.block_until_ready(out_d["loss"])
    out_g = gan(x_fake)
    jax.block_until_ready(out_g["loss"])

    ref = _reference(gan, x_fake, x_real)
    for name, val in ref.items():
        assert jnp.allclose(out_d[name], val, atol=2e-4, rtol=2e-4), name
    ref_gen = -jnp.mean(jax.nn.log_sigmoid(gan.flipped * _ref_logits(gan, x_fake)))
    assert jnp.allclose(out_d["loss-generator"], ref_gen, atol=2e-4, rtol=2e-4)
    assert jnp.allclose(out_g["loss"], ref_gen, atol=2e-4, rtol=2e-4)

    # ---- larger shapes exercising the multi-tile "parallel" grid path ----
    B2, D2, H2 = 512, 128, 64
    kf2, kr2, kw = jax.random.split(jax.random.PRNGKey(1), 3)
    xf2 = jax.random.normal(kf2, (B2, D2), jnp.float32)
    xr2 = jax.random.normal(kr2, (B2, D2), jnp.float32) * 0.7 + 0.3
    gan2 = GANLoss(feature_dim=D2, hidden_dim=H2, flipped=True, key=kw,
                   max_batch_tile=128)  # forces a 4-step grid
    out2 = gan2(xf2, xr2, include_generator_loss=True)
    jax.block_until_ready(out2["loss"])
    ref2 = _reference(gan2, xf2, xr2)
    for name, val in ref2.items():
        assert jnp.allclose(out2[name], val, atol=5e-4, rtol=5e-4), name
    ref_gen2 = -jnp.mean(jax.nn.log_sigmoid(gan2.flipped * _ref_logits(gan2, xf2)))
    assert jnp.allclose(out2["loss-generator"], ref_gen2, atol=5e-4, rtol=5e-4)
    out_g2 = gan2(xf2)
    jax.block_until_ready(out_g2["loss"])
    assert jnp.allclose(out_g2["loss"], ref_gen2, atol=5e-4, rtol=5e-4)

    print("KERNEL_OK")
</pallas_src>

<mosaic_0001>
module attributes {stable_mosaic.version = 11 : i64} {
  func.func @_gan_disc_kernel(%arg0: i32, %arg1: memref<8x32xbf16, #tpu.memory_space<vmem>>, %arg2: memref<8x32xbf16, #tpu.memory_space<vmem>>, %arg3: memref<32x128xbf16, #tpu.memory_space<vmem>>, %arg4: memref<1x128xf32, #tpu.memory_space<vmem>>, %arg5: memref<1x128xf32, #tpu.memory_space<vmem>>, %arg6: memref<1x1xf32, #tpu.memory_space<vmem>>, %arg7: memref<8x128xf32, #tpu.memory_space<vmem>>) attributes {dimension_semantics = [#tpu.dimension_semantics<parallel>], iteration_bounds = array<i64: 1>, scalar_prefetch = 0 : i64, scratch_operands = 0 : i64, tpu.core_type = #tpu.core_type<tc>, window_params = [{transform_indices = @transform_0, window_bounds = array<i64: 8, 32>}, {transform_indices = @transform_1, window_bounds = array<i64: 8, 32>}, {pipeline_mode = #tpu.pipeline_mode<synchronous>, transform_indices = @transform_2, window_bounds = array<i64: 32, 128>}, {pipeline_mode = #tpu.pipeline_mode<synchronous>, transform_indices = @transform_3, window_bounds = array<i64: 1, 128>}, {pipeline_mode = #tpu.pipeline_mode<synchronous>, transform_indices = @transform_4, window_bounds = array<i64: 1, 128>}, {pipeline_mode = #tpu.pipeline_mode<synchronous>, transform_indices = @transform_5, window_bounds = array<i64: 1, 1>}, {transform_indices = @transform_6, window_bounds = array<i64: 8, 128>}]} {
    %c0 = arith.constant 0 : index
    %c0_0 = arith.constant 0 : index
    %0 = vector.load %arg1[%c0, %c0_0] : memref<8x32xbf16, #tpu.memory_space<vmem>>, vector<8x32xbf16>
    %c0_1 = arith.constant 0 : index
    %c0_2 = arith.constant 0 : index
    %1 = vector.load %arg3[%c0_1, %c0_2] : memref<32x128xbf16, #tpu.memory_space<vmem>>, vector<32x128xbf16>
    %cst = arith.constant dense<0.000000e+00> : vector<8x128xf32>
    %2 = tpu.matmul %0, %1, %cst {dimension_numbers = #tpu.dot_dimension_numbers<[1], [0], [0], [1], [0, 0, 1, 1], [], []>} : vector<8x32xbf16>, vector<32x128xbf16>, vector<8x128xf32> -> vector<8x128xf32>
    %c0_3 = arith.constant 0 : index
    %c0_4 = arith.constant 0 : index
    %3 = vector.load %arg4[%c0_3, %c0_4] : memref<1x128xf32, #tpu.memory_space<vmem>>, vector<1x128xf32>
    %4 = vector.broadcast %3 : vector<1x128xf32> to vector<8x128xf32>
    %5 = arith.addf %2, %4 : vector<8x128xf32>
    %6 = math.tanh %5 : vector<8x128xf32>
    %c0_5 = arith.constant 0 : index
    %c0_6 = arith.constant 0 : index
    %7 = vector.load %arg5[%c0_5, %c0_6] : memref<1x128xf32, #tpu.memory_space<vmem>>, vector<1x128xf32>
    "tpu.trace_start"() <{level = 10 : i32, message = "ah,bh->ab"}> : () -> ()
    %cst_7 = arith.constant dense<0.000000e+00> : vector<1x8xf32>
    %8 = tpu.matmul %7, %6, %cst_7 {dimension_numbers = #tpu.dot_dimension_numbers<[1], [1], [0], [0], [0, 0, 1, 0], [], []>} : vector<1x128xf32>, vector<8x128xf32>, vector<1x8xf32> -> vector<1x8xf32>
    "tpu.trace_stop"() : () -> ()
    %c0_8 = arith.constant 0 : index
    %c0_9 = arith.constant 0 : index
    %9 = vector.load %arg6[%c0_8, %c0_9] : memref<1x1xf32, #tpu.memory_space<vmem>>, vector<1x1xf32>
    %10 = vector.broadcast %9 : vector<1x1xf32> to vector<1x8xf32>
    %11 = arith.addf %8, %10 : vector<1x8xf32>
    %c0_10 = arith.constant 0 : index
    %c0_11 = arith.constant 0 : index
    %12 = vector.load %arg2[%c0_10, %c0_11] : memref<8x32xbf16, #tpu.memory_space<vmem>>, vector<8x32xbf16>
    %c0_12 = arith.constant 0 : index
    %c0_13 = arith.constant 0 : index
    %13 = vector.load %arg3[%c0_12, %c0_13] : memref<32x128xbf16, #tpu.memory_space<vmem>>, vector<32x128xbf16>
    %cst_14 = arith.constant dense<0.000000e+00> : vector<8x128xf32>
    %14 = tpu.matmul %12, %13, %cst_14 {dimension_numbers = #tpu.dot_dimension_numbers<[1], [0], [0], [1], [0, 0, 1, 1], [], []>} : vector<8x32xbf16>, vector<32x128xbf16>, vector<8x128xf32> -> vector<8x128xf32>
    %c0_15 = arith.constant 0 : index
    %c0_16 = arith.constant 0 : index
    %15 = vector.load %arg4[%c0_15, %c0_16] : memref<1x128xf32, #tpu.memory_space<vmem>>, vector<1x128xf32>
    %16 = vector.broadcast %15 : vector<1x128xf32> to vector<8x128xf32>
    %17 = arith.addf %14, %16 : vector<8x128xf32>
    %18 = math.tanh %17 : vector<8x128xf32>
    %c0_17 = arith.constant 0 : index
    %c0_18 = arith.constant 0 : index
    %19 = vector.load %arg5[%c0_17, %c0_18] : memref<1x128xf32, #tpu.memory_space<vmem>>, vector<1x128xf32>
    "tpu.trace_start"() <{level = 10 : i32, message = "ah,bh->ab"}> : () -> ()
    %cst_19 = arith.constant dense<0.000000e+00> : vector<1x8xf32>
    %20 = tpu.matmul %19, %18, %cst_19 {dimension_numbers = #tpu.dot_dimension_numbers<[1], [1], [0], [0], [0, 0, 1, 0], [], []>} : vector<1x128xf32>, vector<8x128xf32>, vector<1x8xf32> -> vector<1x8xf32>
    "tpu.trace_stop"() : () -> ()
    %c0_20 = arith.constant 0 : index
    %c0_21 = arith.constant 0 : index
    %21 = vector.load %arg6[%c0_20, %c0_21] : memref<1x1xf32, #tpu.memory_space<vmem>>, vector<1x1xf32>
    %22 = vector.broadcast %21 : vector<1x1xf32> to vector<1x8xf32>
    %23 = arith.addf %20, %22 : vector<1x8xf32>
    %cst_22 = arith.constant 0.000000e+00 : f32
    %24 = vector.broadcast %cst_22 : f32 to vector<1x8xf32>
    %25 = arith.minimumf %11, %24 : vector<1x8xf32>
    %26 = math.absf %11 : vector<1x8xf32>
    %cst_23 = arith.constant 0.000000e+00 : f32
    %27 = vector.broadcast %cst_23 : f32 to vector<1x8xf32>
    %28 = arith.subf %27, %26 : vector<1x8xf32>
    %29 = math.exp %28 : vector<1x8xf32>
    %30 = math.log1p %29 : vector<1x8xf32>
    %31 = arith.subf %25, %30 : vector<1x8xf32>
    %32 = math.exp %31 : vector<1x8xf32>
    %cst_24 = arith.constant 5.000000e-01 : f32
    %33 = vector.broadcast %cst_24 : f32 to vector<1x8xf32>
    %34 = arith.subf %32, %33 : vector<1x8xf32>
    %35 = vector.shape_cast %31 : vector<1x8xf32> to vector<1x1x8xf32>
    %cst_25 = arith.constant dense<0.000000e+00> : vector<1xf32>
    %36 = vector.multi_reduction <add>, %35, %cst_25 [1, 2] : vector<1x1x8xf32> to vector<1xf32>
    %37 = vector.shape_cast %36 : vector<1xf32> to vector<1x1x1xf32>
    %38 = vector.extract %37[0, 0, 0] : f32 from vector<1x1x1xf32>
    %39 = vector.broadcast %38 : f32 to vector<1x1xf32>
    %40 = vector.shape_cast %34 : vector<1x8xf32> to vector<1x1x8xf32>
    %cst_26 = arith.constant dense<0.000000e+00> : vector<1xf32>
    %41 = vector.multi_reduction <add>, %40, %cst_26 [1, 2] : vector<1x1x8xf32> to vector<1xf32>
    %42 = vector.shape_cast %41 : vector<1xf32> to vector<1x1x1xf32>
    %43 = vector.extract %42[0, 0, 0] : f32 from vector<1x1x1xf32>
    %44 = vector.broadcast %43 : f32 to vector<1x1xf32>
    %45 = arith.mulf %34, %34 : vector<1x8xf32>
    %46 = vector.shape_cast %45 : vector<1x8xf32> to vector<1x1x8xf32>
    %cst_27 = arith.constant dense<0.000000e+00> : vector<1xf32>
    %47 = vector.multi_reduction <add>, %46, %cst_27 [1, 2] : vector<1x1x8xf32> to vector<1xf32>
    %48 = vector.shape_cast %47 : vector<1xf32> to vector<1x1x1xf32>
    %49 = vector.extract %48[0, 0, 0] : f32 from vector<1x1x1xf32>
    %50 = vector.broadcast %49 : f32 to vector<1x1xf32>
    %51 = vector.shape_cast %32 : vector<1x8xf32> to vector<1x1x8xf32>
    %cst_28 = arith.constant dense<0x7F800000> : vector<1xf32>
    %52 = vector.multi_reduction <minimumf>, %51, %cst_28 [1, 2] : vector<1x1x8xf32> to vector<1xf32>
    %53 = vector.shape_cast %52 : vector<1xf32> to vector<1x1x1xf32>
    %54 = vector.extract %53[0, 0, 0] : f32 from vector<1x1x1xf32>
    %55 = vector.broadcast %54 : f32 to vector<1x1xf32>
    %56 = vector.shape_cast %32 : vector<1x8xf32> to vector<1x1x8xf32>
    %cst_29 = arith.constant dense<0xFF800000> : vector<1xf32>
    %57 = vector.multi_reduction <maximumf>, %56, %cst_29 [1, 2] : vector<1x1x8xf32> to vector<1xf32>
    %58 = vector.shape_cast %57 : vector<1xf32> to vector<1x1x1xf32>
    %59 = vector.extract %58[0, 0, 0] : f32 from vector<1x1x1xf32>
    %60 = vector.broadcast %59 : f32 to vector<1x1xf32>
    %cst_30 = arith.constant 0.000000e+00 : f32
    %61 = vector.broadcast %cst_30 : f32 to vector<1x8xf32>
    %62 = arith.minimumf %23, %61 : vector<1x8xf32>
    %63 = math.absf %23 : vector<1x8xf32>
    %cst_31 = arith.constant 0.000000e+00 : f32
    %64 = vector.broadcast %cst_31 : f32 to vector<1x8xf32>
    %65 = arith.subf %64, %63 : vector<1x8xf32>
    %66 = math.exp %65 : vector<1x8xf32>
    %67 = math.log1p %66 : vector<1x8xf32>
    %68 = arith.subf %62, %67 : vector<1x8xf32>
    %69 = arith.subf %68, %23 : vector<1x8xf32>
    %70 = math.exp %68 : vector<1x8xf32>
    %cst_32 = arith.constant 5.000000e-01 : f32
    %71 = vector.broadcast %cst_32 : f32 to vector<1x8xf32>
    %72 = arith.subf %70, %71 : vector<1x8xf32>
    %73 = vector.shape_cast %68 : vector<1x8xf32> to vector<1x1x8xf32>
    %cst_33 = arith.constant dense<0.000000e+00> : vector<1xf32>
    %74 = vector.multi_reduction <add>, %73, %cst_33 [1, 2] : vector<1x1x8xf32> to vector<1xf32>
    %75 = vector.shape_cast %74 : vector<1xf32> to vector<1x1x1xf32>
    %76 = vector.extract %75[0, 0, 0] : f32 from vector<1x1x1xf32>
    %77 = vector.broadcast %76 : f32 to vector<1x1xf32>
    %78 = vector.shape_cast %69 : vector<1x8xf32> to vector<1x1x8xf32>
    %cst_34 = arith.constant dense<0.000000e+00> : vector<1xf32>
    %79 = vector.multi_reduction <add>, %78, %cst_34 [1, 2] : vector<1x1x8xf32> to vector<1xf32>
    %80 = vector.shape_cast %79 : vector<1xf32> to vector<1x1x1xf32>
    %81 = vector.extract %80[0, 0, 0] : f32 from vector<1x1x1xf32>
    %82 = vector.broadcast %81 : f32 to vector<1x1xf32>
    %83 = vector.shape_cast %72 : vector<1x8xf32> to vector<1x1x8xf32>
    %cst_35 = arith.constant dense<0.000000e+00> : vector<1xf32>
    %84 = vector.multi_reduction <add>, %83, %cst_35 [1, 2] : vector<1x1x8xf32> to vector<1xf32>
    %85 = vector.shape_cast %84 : vector<1xf32> to vector<1x1x1xf32>
    %86 = vector.extract %85[0, 0, 0] : f32 from vector<1x1x1xf32>
    %87 = vector.broadcast %86 : f32 to vector<1x1xf32>
    %88 = arith.mulf %72, %72 : vector<1x8xf32>
    %89 = vector.shape_cast %88 : vector<1x8xf32> to vector<1x1x8xf32>
    %cst_36 = arith.constant dense<0.000000e+00> : vector<1xf32>
    %90 = vector.multi_reduction <add>, %89, %cst_36 [1, 2] : vector<1x1x8xf32> to vector<1xf32>
    %91 = vector.shape_cast %90 : vector<1xf32> to vector<1x1x1xf32>
    %92 = vector.extract %91[0, 0, 0] : f32 from vector<1x1x1xf32>
    %93 = vector.broadcast %92 : f32 to vector<1x1xf32>
    %94 = vector.shape_cast %70 : vector<1x8xf32> to vector<1x1x8xf32>
    %cst_37 = arith.constant dense<0x7F800000> : vector<1xf32>
    %95 = vector.multi_reduction <minimumf>, %94, %cst_37 [1, 2] : vector<1x1x8xf32> to vector<1xf32>
    %96 = vector.shape_cast %95 : vector<1xf32> to vector<1x1x1xf32>
    %97 = vector.extract %96[0, 0, 0] : f32 from vector<1x1x1xf32>
    %98 = vector.broadcast %97 : f32 to vector<1x1xf32>
    %99 = vector.shape_cast %70 : vector<1x8xf32> to vector<1x1x8xf32>
    %cst_38 = arith.constant dense<0xFF800000> : vector<1xf32>
    %100 = vector.multi_reduction <maximumf>, %99, %cst_38 [1, 2] : vector<1x1x8xf32> to vector<1xf32>
    %101 = vector.shape_cast %100 : vector<1xf32> to vector<1x1x1xf32>
    %102 = vector.extract %101[0, 0, 0] : f32 from vector<1x1x1xf32>
    %103 = vector.broadcast %102 : f32 to vector<1x1xf32>
    %104 = tpu.iota {dimensions = array<i32: 1>} : vector<8x128xi32>
    %cst_39 = arith.constant 0.000000e+00 : f32
    %105 = vector.broadcast %cst_39 : f32 to vector<8x128xf32>
    %c0_i32 = arith.constant 0 : i32
    %106 = vector.broadcast %c0_i32 : i32 to vector<8x128xi32>
    %107 = arith.cmpi eq, %104, %106 : vector<8x128xi32>
    %108 = vector.shape_cast %39 : vector<1x1xf32> to vector<1x1xf32>
    %109 = vector.broadcast %108 : vector<1x1xf32> to vector<8x128xf32>
    %110 = arith.select %107, %109, %105 : vector<8x128xi1>, vector<8x128xf32>
    %c1_i32 = arith.constant 1 : i32
    %111 = vector.broadcast %c1_i32 : i32 to vector<8x128xi32>
    %112 = arith.cmpi eq, %104, %111 : vector<8x128xi32>
    %113 = vector.shape_cast %82 : vector<1x1xf32> to vector<1x1xf32>
    %114 = vector.broadcast %113 : vector<1x1xf32> to vector<8x128xf32>
    %115 = arith.select %112, %114, %110 : vector<8x128xi1>, vector<8x128xf32>
    %c2_i32 = arith.constant 2 : i32
    %116 = vector.broadcast %c2_i32 : i32 to vector<8x128xi32>
    %117 = arith.cmpi eq, %104, %116 : vector<8x128xi32>
    %118 = vector.shape_cast %44 : vector<1x1xf32> to vector<1x1xf32>
    %119 = vector.broadcast %118 : vector<1x1xf32> to vector<8x128xf32>
    %120 = arith.select %117, %119, %115 : vector<8x128xi1>, vector<8x128xf32>
    %c3_i32 = arith.constant 3 : i32
    %121 = vector.broadcast %c3_i32 : i32 to vector<8x128xi32>
    %122 = arith.cmpi eq, %104, %121 : vector<8x128xi32>
    %123 = vector.shape_cast %87 : vector<1x1xf32> to vector<1x1xf32>
    %124 = vector.broadcast %123 : vector<1x1xf32> to vector<8x128xf32>
    %125 = arith.select %122, %124, %120 : vector<8x128xi1>, vector<8x128xf32>
    %c4_i32 = arith.constant 4 : i32
    %126 = vector.broadcast %c4_i32 : i32 to vector<8x128xi32>
    %127 = arith.cmpi eq, %104, %126 : vector<8x128xi32>
    %128 = vector.shape_cast %50 : vector<1x1xf32> to vector<1x1xf32>
    %129 = vector.broadcast %128 : vector<1x1xf32> to vector<8x128xf32>
    %130 = arith.select %127, %129, %125 : vector<8x128xi1>, vector<8x128xf32>
    %c5_i32 = arith.constant 5 : i32
    %131 = vector.broadcast %c5_i32 : i32 to vector<8x128xi32>
    %132 = arith.cmpi eq, %104, %131 : vector<8x128xi32>
    %133 = vector.shape_cast %93 : vector<1x1xf32> to vector<1x1xf32>
    %134 = vector.broadcast %133 : vector<1x1xf32> to vector<8x128xf32>
    %135 = arith.select %132, %134, %130 : vector<8x128xi1>, vector<8x128xf32>
    %c6_i32 = arith.constant 6 : i32
    %136 = vector.broadcast %c6_i32 : i32 to vector<8x128xi32>
    %137 = arith.cmpi eq, %104, %136 : vector<8x128xi32>
    %138 = vector.shape_cast %55 : vector<1x1xf32> to vector<1x1xf32>
    %139 = vector.broadcast %138 : vector<1x1xf32> to vector<8x128xf32>
    %140 = arith.select %137, %139, %135 : vector<8x128xi1>, vector<8x128xf32>
    %c7_i32 = arith.constant 7 : i32
    %141 = vector.broadcast %c7_i32 : i32 to vector<8x128xi32>
    %142 = arith.cmpi eq, %104, %141 : vector<8x128xi32>
    %143 = vector.shape_cast %98 : vector<1x1xf32> to vector<1x1xf32>
    %144 = vector.broadcast %143 : vector<1x1xf32> to vector<8x128xf32>
    %145 = arith.select %142, %144, %140 : vector<8x128xi1>, vector<8x128xf32>
    %c8_i32 = arith.constant 8 : i32
    %146 = vector.broadcast %c8_i32 : i32 to vector<8x128xi32>
    %147 = arith.cmpi eq, %104, %146 : vector<8x128xi32>
    %148 = vector.shape_cast %60 : vector<1x1xf32> to vector<1x1xf32>
    %149 = vector.broadcast %148 : vector<1x1xf32> to vector<8x128xf32>
    %150 = arith.select %147, %149, %145 : vector<8x128xi1>, vector<8x128xf32>
    %c9_i32 = arith.constant 9 : i32
    %151 = vector.broadcast %c9_i32 : i32 to vector<8x128xi32>
    %152 = arith.cmpi eq, %104, %151 : vector<8x128xi32>
    %153 = vector.shape_cast %103 : vector<1x1xf32> to vector<1x1xf32>
    %154 = vector.broadcast %153 : vector<1x1xf32> to vector<8x128xf32>
    %155 = arith.select %152, %154, %150 : vector<8x128xi1>, vector<8x128xf32>
    %c10_i32 = arith.constant 10 : i32
    %156 = vector.broadcast %c10_i32 : i32 to vector<8x128xi32>
    %157 = arith.cmpi eq, %104, %156 : vector<8x128xi32>
    %158 = vector.shape_cast %77 : vector<1x1xf32> to vector<1x1xf32>
    %159 = vector.broadcast %158 : vector<1x1xf32> to vector<8x128xf32>
    %160 = arith.select %157, %159, %155 : vector<8x128xi1>, vector<8x128xf32>
    %c0_40 = arith.constant 0 : index
    %c0_41 = arith.constant 0 : index
    %161 = vector.load %arg7[%c0_40, %c0_41] : memref<8x128xf32, #tpu.memory_space<vmem>>, vector<8x128xf32>
    tpu.vector_store %arg7[%c0_40, %c0_41], %160 {strides = array<i32>} : memref<8x128xf32, #tpu.memory_space<vmem>>, vector<8x128xf32>,
    return
  }
  func.func @transform_0(%arg0: i32) -> (i32, i32) {
    %c0_i32 = arith.constant 0 : i32
    %c0_i32_0 = arith.constant 0 : i32
    return %arg0, %c0_i32 : i32, i32
  }
  func.func @transform_1(%arg0: i32) -> (i32, i32) {
    %c0_i32 = arith.constant 0 : i32
    %c0_i32_0 = arith.constant 0 : i32
    return %arg0, %c0_i32 : i32, i32
  }
  func.func @transform_2(%arg0: i32) -> (i32, i32) {
    %c0_i32 = arith.constant 0 : i32
    %c0_i32_0 = arith.constant 0 : i32
    %c0_i32_1 = arith.constant 0 : i32
    return %c0_i32, %c0_i32_0 : i32, i32
  }
  func.func @transform_3(%arg0: i32) -> (i32, i32) {
    %c0_i32 = arith.constant 0 : i32
    %c0_i32_0 = arith.constant 0 : i32
    %c0_i32_1 = arith.constant 0 : i32
    return %c0_i32, %c0_i32_0 : i32, i32
  }
  func.func @transform_4(%arg0: i32) -> (i32, i32) {
    %c0_i32 = arith.constant 0 : i32
    %c0_i32_0 = arith.constant 0 : i32
    %c0_i32_1 = arith.constant 0 : i32
    return %c0_i32, %c0_i32_0 : i32, i32
  }
  func.func @transform_5(%arg0: i32) -> (i32, i32) {
    %c0_i32 = arith.constant 0 : i32
    %c0_i32_0 = arith.constant 0 : i32
    %c0_i32_1 = arith.constant 0 : i32
    return %c0_i32, %c0_i32_0 : i32, i32
  }
  func.func @transform_6(%arg0: i32) -> (i32, i32) {
    %c0_i32 = arith.constant 0 : i32
    %c0_i32_0 = arith.constant 0 : i32
    return %arg0, %c0_i32 : i32, i32
  }
}

</mosaic_0001>

<bundles_post_ra>
// kernel: tpu_custom_call.1
= control target key start
LH: loop header
LB: loop body
LE: loop exit
PB: predicated region body
PF: predicated region fallthrough
CT: control target
= control target key end

     0   :  { %s856_s0 = inlined_call_operand.hbm [shape: bf16[8,32], index: 0, kind: input, shape index: {}]   ;;  %s857_s1 = inlined_call_operand.vmem [shape: bf16[8,32], index: 1, kind: input, shape index: {}]   ;;  %s858_s2 = inlined_call_operand.hbm [shape: bf16[32,128], index: 2, kind: input, shape index: {}]   ;;  %s859_s3 = inlined_call_operand.vmem [shape: f32[1,128], index: 3, kind: input, shape index: {}]   ;;  %s860_s4 = inlined_call_operand.vmem [shape: f32[1,128], index: 4, kind: input, shape index: {}]   ;;  %s861_s5 = inlined_call_operand.<no memory space> [shape: f32[1,1], index: 5, kind: input, shape index: {}]   ;;  %s862_s6 = inlined_call_operand.hbm [shape: f32[8,128], index: 6, kind: output, shape index: {}]  }
   0x1   :  { %v11_v0 = vstv %s861_s5 }
   0x2   :  { %12 = vst [vmem:[#allocation2] sm:$0x1] %v11_v0 }
   0x3   :  { %13 = vsyncpa [#allocation4], 0 }
   0x4   :  { %14 = vsyncpa [#allocation7], 0 }
   0x5   :  { %15 = vsyncpa [#allocation5], 0  ;;  %s723_s23 = smov [#allocation3]   ;;  %s724_s25 = smov [#allocation6]  }
   0x6   :  { %s22_s24 = sshll.u32 %s723_s23, 4  ;;  %s33_s26 = sshll.u32 %s724_s25, 4  ;;  %s23_s24 = int_to_ptr.vmem [resolvable:$true] %s22_s24  ;;  %s769_s26 = int_to_ptr.vmem [resolvable:$true] %s33_s26 }
   0x7   :  { %s651_s29 = scalar_lea.hbm %s856_s0, 64 }
   0x8   :  { %p652_p0 = scmp.ne.s32.totalorder %s856_s0, %s651_s29  ;;  %p655_p1 = scmp.lt.u32.totalorder %s651_s29, %s856_s0 }
   0xa   :  { %p657_p2 = pnand %p655_p1, %p652_p0 }
   0xc   :  { %660 = shalt.err (!%p657_p2)
}
   0xd   :  { %s661_s9 = scalar_lea.vmem %s23_s24, 64  ;;  %p666_p4 = scmp.lt.s32.totalorder %s23_s24, %s23_s24 }
   0xe   :  { %p662_p3 = scmp.ne.s32.totalorder %s23_s24, %s661_s9  ;;  %p667_p5 = scmp.lt.s32.totalorder %s661_s9, %s661_s9 }
  0x10   :  { %p668_p6 = por %p667_p5, %p666_p4 }
  0x12   :  { %p669_p7 = pnand %p668_p6, %p662_p3 }
  0x14   :  { %672 = shalt.err (!%p669_p7)
}
  0x15   :  { %25 = dma.hbm_to_vmem [thread:$0]  %s856_s0, 64, %s23_s24, [#allocation4]  }
  0x16   :  { %s673_s14 = scalar_lea.hbm %s858_s2, 256 }
  0x17   :  { %p674_p8 = scmp.ne.s32.totalorder %s858_s2, %s673_s14  ;;  %p677_p9 = scmp.lt.u32.totalorder %s673_s14, %s858_s2 }
  0x19   :  { %p679_p10 = pnand %p677_p9, %p674_p8 }
  0x1b   :  { %682 = shalt.err (!%p679_p10)
}
  0x1c   :  { %s683_s19 = scalar_lea.vmem %s769_s26, 256  ;;  %p688_p12 = scmp.lt.s32.totalorder %s769_s26, %s769_s26 }
  0x1d   :  { %p684_p11 = scmp.ne.s32.totalorder %s769_s26, %s683_s19  ;;  %p689_p13 = scmp.lt.s32.totalorder %s683_s19, %s683_s19 }
  0x1f   :  { %p690_p0 = por %p689_p13, %p688_p12 }
  0x21   :  { %p691_p1 = pnand %p690_p0, %p684_p11 }
  0x23   :  { %694 = shalt.err (!%p691_p1)
}
  0x24   :  { %s725_s0 = smov 64   ;;  %s726_s20 = smov 4  }
  0x25   :  { %39 = dma.hbm_to_vmem [thread:$0]  %s858_s2, 256, %s769_s26, [#allocation7], %s725_s0, %s725_s0, %s726_s20  }
  0x26   :  { %717 = dma.done.wait [#allocation4], 64  }
  0x27   :  { %718 = vsyncadd [#allocation4], 4294967232 }
  0x28   :  { %719 = dma.done.wait [#allocation7], 256  }
  0x29   :  { %720 = vsyncadd [#allocation7], 4294967040  ;;  %v727_v1 = vmov 0.0   ;;  %vm728_vm0 = vmmov 0   ;;  %v631_v2 = vld [vmem:[#allocation6] sm:$0xff]   ;;  %v632_v3 = vld [vmem:[#allocation6 + $0x8] sm:$0xff]   ;;  %v129_v19 = vlaneseq }
  0x2a   :  { %574 = vmatprep.subr.bf16.mxu0 %v727_v1  ;;  %578 = vmatprep.mubr.msk.bf16.mxu0 %vm728_vm0, %v727_v1  ;;  %v53_v4 = vld [vmem:[#allocation3] sm:$0xf]  ;;  %vm77_vm1 = vcmask 261120   ;;  %v123_v5 = vld [vmem:[#allocation2] sm:$0x1]  ;;  %v729_v6 = vmov 0  }
  0x2b   :  { %582 = vmatprep.subr.mxu1 %v727_v1  ;;  %584 = vmatprep.mubr.msk.f32.mxu1 %vm728_vm0, %v727_v1  ;;  %v554_v7 = vld [vmem:[%s859_s3] ss:$0 sm:$0xff]  ;;  %v633_v15 = vld [vmem:[#allocation6] sm:$0xff]   ;;  %v634_v16 = vld [vmem:[#allocation6 + $0x8] sm:$0xff]   ;;  %v816_v20 = vshrl.u32 %v129_v19, 7  ;;  %vm370_vm3 = vcmask 57344  }
  0x2c   :  { %575 = vmatpush3.bf16.msra.mxu0 %v631_v2  ;;  %630 = vset.pattern.permute.xlu0 %v729_v6  ;;  %v122_v14 = vld [vmem:[%s860_s4] sm:$0x1]  ;;  %s730_s12 = smov [#allocation8]  }
  0x2d   :  { %576 = vmatprep.subr.bf16.mxu0 %v727_v1  ;;  %126 = vperm.xlu0 %630, %v123_v5   ;;  %v203_v17 = vld [vmem:[%s857_s1] sm:$0xf]  ;;  %v131_v21 = vsub.s32 0, %v816_v20  ;;  %s544_s13 = sshll.u32 %s730_s12, 4  ;;  %s545_s13 = int_to_ptr.vmem [resolvable:$true] %s544_s13 }
  0x2e   :  { %v272_v18 = vld [vmem:[#allocation2] sm:$0x1]  ;;  %s695_s15 = scalar_lea.vmem %s545_s13, 128  ;;  %p700_p3 = scmp.lt.s32.totalorder %s545_s13, %s545_s13 }
  0x2f   :  { %v271_v38 = vld [vmem:[%s860_s4] sm:$0x1]  ;;  %p696_p2 = scmp.ne.s32.totalorder %s545_s13, %s695_s15  ;;  %p701_p4 = scmp.lt.s32.totalorder %s695_s15, %s695_s15 }
  0x30   :  { %577 = vmatpush3.bf16.msra.mxu0 %v632_v3 }
  0x31   :  { %595 = vmatprep.subr.mxu0 %v727_v1  ;;  %275 = vperm.xlu0 %630, %v272_v18   ;;  %p702_p5 = por %p701_p4, %p700_p3 }
  0x33   :  { %579 = vmatmul.mubr.msk.bf16.vlgmr.msra.gmra.mrb[0].mxu0 %vm77_vm1, %v53_v4  ;;  %p703_p6 = pnand %p702_p5, %p696_p2 }
  0x34   :  { %597 = vmatprep.mubr.msk.f32.mxu0 %vm728_vm0, %v727_v1 }
  0xac   :  { %v127_v22 = vpop.permute.xlu0 %126 }
  0xad   :  { %v132_v23 = vrot.slane %v127_v22, %v131_v21 }
  0xb0   :  { %v276_v63 = vpop.permute.xlu0 %275 }
 0x106   :  { %v115_v8 = vpop.f32.mrb[0].mxu0 }
 0x107   :  { %v116_v9 = vadd.f32 %v554_v7, %v115_v8  ;;  %v580_v10 = vpop.f32.mrb[1].mxu0 }
 0x108   :  { %v118_v11 = vpop.f32.mrb[2].mxu0 }
 0x109   :  { %635 = vtanh.f32 %v116_v9  ;;  %v581_v12 = vpop.f32.mrb[3].mxu0 }
 0x113   :  { %v636_v13 = vpop.eup %635 }
 0x114   :  { %583 = vmatpush3.xpose.msra.mxu1 %v636_v13 }
 0x115   :  { %587 = vmatprep.subr.bf16.mxu1 %v727_v1 }
 0x117   :  { %585 = vmatmul.mubr.f32.vlgmr.msra.gmra.mrb[0].mxu1 %v122_v14 }
 0x118   :  { %588 = vmatpush3.bf16.msra.mxu1 %v633_v15  ;;  %591 = vmatprep.mubr.msk.bf16.mxu1 %vm728_vm0, %v727_v1 }
 0x119   :  { %589 = vmatprep.subr.bf16.mxu1 %v727_v1 }
 0x11c   :  { %590 = vmatpush3.bf16.msra.mxu1 %v634_v16 }
 0x11f   :  { %592 = vmatmul.mubr.msk.bf16.vlgmr.msra.gmra.mrb[4].mxu1 %vm77_vm1, %v203_v17 }
 0x1ea   :  { %v199_v24 = vpop.f32.mrb[0].mxu1 }
 0x1eb   :  { %v200_v25 = vadd.f32 %v199_v24, %v132_v23  ;;  %v586_v26 = vpop.f32.mrb[1].mxu1 }
 0x1ed   :  { %v353_v27 = vand.u32 2147483647, %v200_v25  ;;  %v352_v45 = vmin.f32 %v200_v25, 0.0 }
 0x1ef   :  { %v354_v28 = vsub.f32 0.0, %v353_v27 }
 0x1f1   :  { %v355_v29 = vmul.f32 1.442695, %v354_v28 }
 0x1f2   :  { %v264_v30 = vpop.f32.mrb[4].mxu1 }
 0x1f3   :  { %637 = vpow2.f32 %v355_v29  ;;  %v265_v31 = vadd.f32 %v554_v7, %v264_v30  ;;  %v593_v32 = vpop.f32.mrb[5].mxu1 }
 0x1f4   :  { %v267_v33 = vpop.f32.mrb[6].mxu1  ;;  %v281_v32 = vrot.slane %v276_v63, %v131_v21 }
 0x1f5   :  { %639 = vtanh.f32 %v265_v31  ;;  %v594_v34 = vpop.f32.mrb[7].mxu1 }
 0x1fd   :  { %v638_v35 = vpop.eup %637 }
 0x1fe   :  { %v357_v36 = vadd.f32 1.0, %v638_v35  ;;  %v360_v39 = vmul.f32 -0.5, %v638_v35  ;;  %v363_v41 = vand.u32 2147483647, %v638_v35 }
 0x1ff   :  { %v640_v37 = vpop.eup %639 }
 0x200   :  { %596 = vmatpush3.xpose.msra.mxu0 %v640_v37  ;;  %641 = vlog2.f32 %v357_v36  ;;  %v361_v40 = vadd.f32 1.0, %v360_v39  ;;  %vm364_vm2 = vcmp.lt.f32.partialorder %v363_v41, 0.0004427343 }
 0x202   :  { %v362_v44 = vmul.f32 %v638_v35, %v361_v40 }
 0x203   :  { %598 = vmatmul.mubr.f32.vlgmr.msra.gmra.mrb[4].mxu0 %v271_v38 }
 0x20a   :  { %v642_v42 = vpop.eup %641 }
 0x20b   :  { %v359_v43 = vmul.f32 0.6931472, %v642_v42 }
 0x20d   :  { %v365_v46 = vsel %vm364_vm2, %v362_v44, %v359_v43 }
 0x20e   :  { %v366_v47 = vsub.f32 %v352_v45, %v365_v46 }
 0x210   :  { %v371_v48 = vsel %vm370_vm3, %v366_v47, 0.0  ;;  %v367_v49 = vmul.f32 1.442695, %v366_v47 }
 0x211   :  { %372 = vadd.xlane.f32.xlu1 %v371_v48 }
 0x212   :  { %643 = vpow2.f32 %v367_v49 }
 0x21c   :  { %v644_v50 = vpop.eup %643 }
 0x21d   :  { %v562_v51 = vadd.f32 -0.5, %v644_v50  ;;  %v402_v55 = vsel %vm370_vm3, %v644_v50, inf  ;;  %v412_v56 = vsel %vm370_vm3, %v644_v50, -inf }
 0x21f   :  { %v381_v52 = vsel %vm370_vm3, %v562_v51, 0.0  ;;  %v391_v53 = vmul.f32 %v562_v51, %v562_v51 }
 0x220   :  { %382 = vadd.xlane.f32.xlu1 %v381_v52 }
 0x221   :  { %v392_v54 = vsel %vm370_vm3, %v391_v53, 0.0 }
 0x222   :  { %393 = vadd.xlane.f32.xlu0 %v392_v54 }
 0x224   :  { %403 = vmin.xlane.f32.xlu1 %v402_v55 }
 0x228   :  { %413 = vmax.xlane.f32.xlu1 %v412_v56 }
 0x29e   :  { %v373_v57 = vpop.xlane.xlu1 %372 }
 0x29f   :  { %v374_v58 = vrot.slane %v373_v57, 4 }
 0x2a1   :  { %v375_v59 = vadd.f32 %v374_v58, %v373_v57 }
 0x2a3   :  { %v376_v60 = vrot.slane %v375_v59, 2 }
 0x2a5   :  { %v377_v61 = vadd.f32 %v376_v60, %v375_v59 }
 0x2a7   :  { %v378_v62 = vrot.slane %v377_v61, 1 }
 0x2a9   :  { %v379_v0 = vadd.f32 %v378_v62, %v377_v61 }
 0x2ab   :  { %600 = vpush %v379_v0 }
 0x2ad   :  { %v383_v1 = vpop.xlane.xlu1 %382 }
 0x2ae   :  { %v384_v2 = vrot.slane %v383_v1, 4 }
 0x2af   :  { %v394_v3 = vpop.xlane.xlu0 %393 }
 0x2b0   :  { %v385_v4 = vadd.f32 %v384_v2, %v383_v1  ;;  %v395_v5 = vrot.slane %v394_v3, 4 }
 0x2b1   :  { %v404_v6 = vpop.xlane.xlu1 %403 }
 0x2b2   :  { %v386_v7 = vrot.slane %v385_v4, 2  ;;  %v396_v8 = vadd.f32 %v395_v5, %v394_v3  ;;  %v405_v9 = vrot.slane %v404_v6, 4 }
 0x2b4   :  { %v397_v10 = vrot.slane %v396_v8, 2  ;;  %v406_v11 = vmin.f32 %v404_v6, %v405_v9  ;;  %v387_v12 = vadd.f32 %v386_v7, %v385_v4 }
 0x2b5   :  { %v414_v13 = vpop.xlane.xlu1 %413 }
 0x2b6   :  { %v398_v14 = vadd.f32 %v397_v10, %v396_v8  ;;  %v407_v15 = vrot.slane %v406_v11, 2  ;;  %v415_v16 = vrot.slane %v414_v13, 4  ;;  %v388_v17 = vrot.slane %v387_v12, 1 }
 0x2b8   :  { %v416_v18 = vmax.f32 %v414_v13, %v415_v16  ;;  %v389_v22 = vadd.f32 %v388_v17, %v387_v12  ;;  %v399_v23 = vrot.slane %v398_v14, 1  ;;  %v408_v24 = vmin.f32 %v406_v11, %v407_v15 }
 0x2ba   :  { %v417_v25 = vrot.slane %v416_v18, 2  ;;  %602 = vpush %v389_v22  ;;  %v400_v26 = vadd.f32 %v399_v23, %v398_v14  ;;  %v409_v27 = vrot.slane %v408_v24, 1 }
 0x2bc   :  { %604 = vpush %v400_v26  ;;  %v410_v28 = vmin.f32 %v408_v24, %v409_v27  ;;  %v418_v29 = vmax.f32 %v416_v18, %v417_v25 }
 0x2be   :  { %606 = vpush %v410_v28  ;;  %v419_v30 = vrot.slane %v418_v29, 1 }
 0x2c0   :  { %v420_v31 = vmax.f32 %v418_v29, %v419_v30 }
 0x2c2   :  { %608 = vpush %v420_v31 }
 0x2d6   :  { %v348_v33 = vpop.f32.mrb[4].mxu0 }
 0x2d7   :  { %v349_v34 = vadd.f32 %v348_v33, %v281_v32  ;;  %v599_v35 = vpop.f32.mrb[5].mxu0 }
 0x2d9   :  { %v423_v36 = vand.u32 2147483647, %v349_v34  ;;  %v422_v47 = vmin.f32 %v349_v34, 0.0 }
 0x2db   :  { %v424_v37 = vsub.f32 0.0, %v423_v36 }
 0x2dc   :  { %s601_s4 = spop %600 }
 0x2dd   :  { %v425_v38 = vmul.f32 1.442695, %v424_v37 }
 0x2df   :  { %645 = vpow2.f32 %v425_v38 }
 0x2e9   :  { %v646_v39 = vpop.eup %645 }
 0x2ea   :  { %v427_v40 = vadd.f32 1.0, %v646_v39  ;;  %v430_v41 = vmul.f32 -0.5, %v646_v39  ;;  %v433_v43 = vand.u32 2147483647, %v646_v39 }
 0x2eb   :  { %s603_s28 = spop %602 }
 0x2ec   :  { %647 = vlog2.f32 %v427_v40  ;;  %v431_v42 = vadd.f32 1.0, %v430_v41  ;;  %vm434_vm4 = vcmp.lt.f32.partialorder %v433_v43, 0.0004427343  ;;  %v503_v40 = vand.u32 127, %v129_v19 }
 0x2ed   :  { %s605_s29 = spop %604  ;;  %v505_v41 = vstv %s601_s4 }
 0x2ee   :  { %v432_v46 = vmul.f32 %v646_v39, %v431_v42  ;;  %vm504_vm5 = vcmp.eq.s32.totalorder %v503_v40, 0  ;;  %vm507_vm6 = vcmp.eq.s32.totalorder %v503_v40, 1  ;;  %vm510_vm7 = vcmp.eq.s32.totalorder %v503_v40, 2 }
 0x2ef   :  { %s607_s30 = spop %606  ;;  %v506_v43 = vsel %vm504_vm5, %v505_v41, 0.0  ;;  %vm513_vm8 = vcmp.eq.s32.totalorder %v503_v40, 3  ;;  %vm516_vm9 = vcmp.eq.s32.totalorder %v503_v40, 4  ;;  %vm519_vm10 = vcmp.eq.s32.totalorder %v503_v40, 5 }
 0x2f0   :  { %v517_v19 = vstv %s605_s29  ;;  %vm522_vm11 = vcmp.eq.s32.totalorder %v503_v40, 6  ;;  %vm525_vm12 = vcmp.eq.s32.totalorder %v503_v40, 7  ;;  %vm528_vm13 = vcmp.eq.s32.totalorder %v503_v40, 8 }
 0x2f1   :  { %vm531_vm14 = vcmp.eq.s32.totalorder %v503_v40, 9  ;;  %vm534_vm15 = vcmp.eq.s32.totalorder %v503_v40, 10 }
 0x2f3   :  { %s838_s7 = spop %608 }
 0x2f6   :  { %v648_v44 = vpop.eup %647 }
 0x2f7   :  { %v429_v45 = vmul.f32 0.6931472, %v648_v44 }
 0x2f9   :  { %v435_v20 = vsel %vm434_vm4, %v432_v46, %v429_v45  ;;  %v511_v45 = vstv %s603_s28 }
 0x2fa   :  { %v436_v21 = vsub.f32 %v422_v47, %v435_v20 }
 0x2fc   :  { %v441_v48 = vsel %vm370_vm3, %v436_v21, 0.0  ;;  %v438_v49 = vmul.f32 1.442695, %v436_v21  ;;  %v437_v50 = vsub.f32 %v436_v21, %v349_v34 }
 0x2fd   :  { %442 = vadd.xlane.f32.xlu1 %v441_v48 }
 0x2fe   :  { %649 = vpow2.f32 %v438_v49  ;;  %v451_v51 = vsel %vm370_vm3, %v437_v50, 0.0  ;;  %v523_v49 = vstv %s607_s30 }
 0x301   :  { %452 = vadd.xlane.f32.xlu1 %v451_v51 }
 0x308   :  { %v650_v52 = vpop.eup %649 }
 0x309   :  { %v482_v53 = vsel %vm370_vm3, %v650_v52, inf  ;;  %v563_v54 = vadd.f32 -0.5, %v650_v52  ;;  %v492_v58 = vsel %vm370_vm3, %v650_v52, -inf }
 0x30a   :  { %483 = vmin.xlane.f32.xlu1 %v482_v53  ;;  %v529_v53 = vstv %s838_s7 }
 0x30b   :  { %v461_v55 = vsel %vm370_vm3, %v563_v54, 0.0  ;;  %v471_v56 = vmul.f32 %v563_v54, %v563_v54 }
 0x30d   :  { %v472_v57 = vsel %vm370_vm3, %v471_v56, 0.0 }
 0x30e   :  { %462 = vadd.xlane.f32.xlu1 %v461_v55 }
 0x312   :  { %473 = vadd.xlane.f32.xlu1 %v472_v57 }
 0x316   :  { %493 = vmax.xlane.f32.xlu1 %v492_v58 }
 0x38a   :  { %v443_v59 = vpop.xlane.xlu1 %442 }
 0x38b   :  { %v444_v60 = vrot.slane %v443_v59, 4 }
 0x38d   :  { %v445_v61 = vadd.f32 %v444_v60, %v443_v59 }
 0x38e   :  { %v453_v62 = vpop.xlane.xlu1 %452 }
 0x38f   :  { %v446_v63 = vrot.slane %v445_v61, 2  ;;  %v454_v0 = vrot.slane %v453_v62, 4 }
 0x391   :  { %v455_v1 = vadd.f32 %v454_v0, %v453_v62  ;;  %v447_v2 = vadd.f32 %v446_v63, %v445_v61 }
 0x393   :  { %v456_v3 = vrot.slane %v455_v1, 2  ;;  %v448_v4 = vrot.slane %v447_v2, 1 }
 0x395   :  { %v449_v5 = vadd.f32 %v448_v4, %v447_v2  ;;  %v457_v6 = vadd.f32 %v456_v3, %v455_v1 }
 0x397   :  { %610 = vpush %v449_v5  ;;  %v484_v7 = vpop.xlane.xlu1 %483  ;;  %v458_v8 = vrot.slane %v457_v6, 1 }
 0x398   :  { %v485_v9 = vrot.slane %v484_v7, 4 }
 0x399   :  { %v459_v10 = vadd.f32 %v458_v8, %v457_v6 }
 0x39a   :  { %v486_v11 = vmin.f32 %v484_v7, %v485_v9 }
 0x39b   :  { %612 = vpush %v459_v10  ;;  %v463_v12 = vpop.xlane.xlu1 %462 }
 0x39c   :  { %v464_v13 = vrot.slane %v463_v12, 4  ;;  %v487_v15 = vrot.slane %v486_v11, 2 }
 0x39e   :  { %v465_v14 = vadd.f32 %v464_v13, %v463_v12  ;;  %v488_v25 = vmin.f32 %v486_v11, %v487_v15 }
 0x39f   :  { %v474_v16 = vpop.xlane.xlu1 %473 }
 0x3a0   :  { %v466_v17 = vrot.slane %v465_v14, 2  ;;  %v475_v18 = vrot.slane %v474_v16, 4  ;;  %v489_v32 = vrot.slane %v488_v25, 1 }
 0x3a2   :  { %v476_v22 = vadd.f32 %v475_v18, %v474_v16  ;;  %v467_v23 = vadd.f32 %v466_v17, %v465_v14  ;;  %v490_v37 = vmin.f32 %v488_v25, %v489_v32 }
 0x3a3   :  { %v494_v24 = vpop.xlane.xlu1 %493 }
 0x3a4   :  { %v477_v26 = vrot.slane %v476_v22, 2  ;;  %v495_v27 = vrot.slane %v494_v24, 4  ;;  %v468_v28 = vrot.slane %v467_v23, 1 }
 0x3a6   :  { %v496_v29 = vmax.f32 %v494_v24, %v495_v27  ;;  %v469_v30 = vadd.f32 %v468_v28, %v467_v23  ;;  %v478_v31 = vadd.f32 %v477_v26, %v476_v22 }
 0x3a8   :  { %v497_v33 = vrot.slane %v496_v29, 2  ;;  %614 = vpush %v469_v30  ;;  %v479_v34 = vrot.slane %v478_v31, 1 }
 0x3aa   :  { %v498_v35 = vmax.f32 %v496_v29, %v497_v33  ;;  %v480_v36 = vadd.f32 %v479_v34, %v478_v31 }
 0x3ac   :  { %616 = vpush %v480_v36  ;;  %v499_v38 = vrot.slane %v498_v35, 1 }
 0x3ad   :  { %618 = vpush %v490_v37 }
 0x3ae   :  { %v500_v39 = vmax.f32 %v498_v35, %v499_v38 }
 0x3b0   :  { %620 = vpush %v500_v39 }
 0x3c8   :  { %s840_s5 = spop %610 }
 0x3c9   :  { %v535_v57 = vstv %s840_s5 }
 0x3cc   :  { %s613_s8 = spop %612 }
 0x3cd   :  { %v508_v42 = vstv %s613_s8 }
 0x3ce   :  { %v509_v44 = vsel %vm507_vm6, %v508_v42, %v506_v43 }
 0x3cf   :  { %v512_v46 = vsel %vm510_vm7, %v511_v45, %v509_v44 }
 0x3d9   :  { %s615_s9 = spop %614 }
 0x3da   :  { %v514_v47 = vstv %s615_s9 }
 0x3db   :  { %v515_v20 = vsel %vm513_vm8, %v514_v47, %v512_v46 }
 0x3dc   :  { %v518_v21 = vsel %vm516_vm9, %v517_v19, %v515_v20 }
 0x3dd   :  { %s617_s10 = spop %616 }
 0x3de   :  { %v520_v48 = vstv %s617_s10  ;;  %s619_s11 = spop %618 }
 0x3df   :  { %v521_v50 = vsel %vm519_vm10, %v520_v48, %v518_v21  ;;  %v526_v52 = vstv %s619_s11 }
 0x3e0   :  { %v524_v51 = vsel %vm522_vm11, %v523_v49, %v521_v50 }
 0x3e1   :  { %v527_v54 = vsel %vm525_vm12, %v526_v52, %v524_v51  ;;  %s621_s14 = spop %620 }
 0x3e2   :  { %v530_v55 = vsel %vm528_vm13, %v529_v53, %v527_v54  ;;  %v532_v56 = vstv %s621_s14 }
 0x3e3   :  { %v533_v58 = vsel %vm531_vm14, %v532_v56, %v530_v55 }
 0x3e4   :  { %v536_v59 = vsel %vm534_vm15, %v535_v57, %v533_v58 }
 0x3e5   :  { %537 = vst [vmem:[#allocation8] sm:$0xff] %v536_v59 }
 0x3e6   :  { %706 = shalt.err (!%p703_p6)
}
 0x3e7   :  { %s707_s18 = scalar_lea.hbm %s862_s6, 128 }
 0x3e8   :  { %p708_p7 = scmp.ne.s32.totalorder %s862_s6, %s707_s18  ;;  %p711_p8 = scmp.lt.u32.totalorder %s707_s18, %s862_s6 }
 0x3ea   :  { %p713_p9 = pnand %p711_p8, %p708_p7 }
 0x3ec   :  { %716 = shalt.err (!%p713_p9)
}
 0x3ed   :  { %547 = dma.vmem_to_hbm [thread:$0]  %s545_s13, 128, %s862_s6, [#allocation5]  }
 0x3ee   :  { %721 = dma.done.wait [#allocation5], 128  }
 0x3ef   :  { %722 = vsyncadd [#allocation5], 4294967168 }
 0x3f0   :  { %551 = vsyncpa [#allocation4], 1 }
 0x3f1   :  { %552 = vsyncpa [#allocation7], 1 }
 0x3f2   :  { %553 = vsyncpa [#allocation5], 1 }

</bundles_post_ra>
